<compile_context>
chip_gen: v6e
topology: v6e:2x2x1
jax: 0.10.0
libtpu: 0.0.40
codegen_flags: <defaults>
</compile_context>

<pallas_src>
import jax
import jax.numpy as jnp
from jax import lax
from jax.experimental import pallas as pl
from jax.experimental.pallas import tpu as pltpu


def self_attention_kernel(x_ref, k_ref, wqv_ref, part_ref, att_ref):
    i = pl.program_id(1)            # query-row-tile step within this core
    d = k_ref.shape[1]
    mxu_dtype = k_ref.dtype

    @pl.when(i == 0)
    def _init():
        part_ref[...] = jnp.zeros_like(part_ref)

    # Fused Q (0.06 pre-folded into the weight) + V projection for this row
    # tile: one MXU call producing (tile_n, 2d), then static column split.
    qv = jnp.dot(x_ref[...], wqv_ref[...], preferred_element_type=jnp.float32)
    q = qv[:, :d].astype(mxu_dtype)
    v_tile = qv[:, d:].astype(mxu_dtype)

    # logits = Q_tile @ K^T, expressed via contraction dims (trans_b form —
    # absorbed by the MXU, no explicit transpose materialized).
    logits = lax.dot_general(q, k_ref[...], (((1,), (1,)), ((), ())),
                             preferred_element_type=jnp.float32)

    # Row-wise numerically stable softmax, kept entirely in f32.
    # (pl.reciprocal(..., approx=True) is available when tolerances allow.)
    row_max = jnp.max(logits, axis=-1, keepdims=True)
    e = jnp.exp(logits - row_max)
    row_sum = jnp.sum(e, axis=-1, keepdims=True)
    att = e / row_sum
    att_ref[...] = att.astype(att_ref.dtype)

    # Partial accumulation of att^T @ V (contraction over the tile rows) into
    # this core's resident (1, n, d) output block.
    contrib = lax.dot_general(att.astype(mxu_dtype), v_tile,
                              (((0,), (0,)), ((), ())),
                              preferred_element_type=jnp.float32)
    part_ref[...] += contrib[None]


def _pick_tile_n(n, tile_n):
    """Largest divisor of n that is a multiple of 8 and <= tile_n, else n."""
    tile_n = max(8, min(tile_n, n))
    start = tile_n - (tile_n % 8)
    for t in range(start, 7, -8):
        if n % t == 0:
            return t
    return n   # single full-size tile (full-array blocks are always legal)


def _device_vmem_cap():
    try:
        info = pltpu.get_tpu_info()
        cap = int(getattr(info, "vmem_capacity_bytes", 64 << 20))
    except Exception:
        cap = 64 << 20      # conservative (v7x per-TC) default
    return int(cap * 0.85)  # headroom for Mosaic internal scratch


def self_attention(x, wk, wq, wv, wo, *, tile_n=256, num_cores=2,
                   mxu_dtype=jnp.bfloat16):
    """x: (n, m) f32. wk/wq/wv: (d, m) like nn.Linear. wo: (m, d).

    tile_n=256 is a good default for v7x (64 MiB VMEM); 512 has headroom on
    v5e/v6e (128 MiB).  mxu_dtype=jnp.float32 gives bit-tight results.
    """
    n, m = x.shape
    d = wk.shape[0]
    f32 = jnp.float32

    tile_n = _pick_tile_n(n, tile_n)
    n_tiles = n // tile_n
    num_cores = max(1, num_cores)
    if n_tiles % num_cores != 0:
        num_cores = 1
    steps = n_tiles // num_cores

    # Weight prep (XLA): nn.Linear stores (out, in) and computes x @ W^T, so
    # pre-transpose; fold the 0.06 query scale into Wq; fuse Q and V weights.
    wqv_t = jnp.concatenate([wq.T * f32(0.06), wv.T], axis=1).astype(mxu_dtype)
    wo_t = wo.T.astype(mxu_dtype)                                  # (d, m)
    # Prologue hoist: K projection runs as one dense XLA matmul; the kernel
    # keeps K resident and streams x row tiles.
    k_full = jnp.dot(x, wk.T, preferred_element_type=f32).astype(mxu_dtype)
    x_in = x.astype(mxu_dtype)

    # VMEM budget: count default double-buffering (worst case if Buffered(1)
    # is unavailable) plus in-kernel temporaries, then clamp to the chip cap.
    bm = jnp.dtype(mxu_dtype).itemsize
    est = (2 * tile_n * m * bm            # x tiles (double-buffered)
           + 2 * n * d * bm               # K resident
           + 2 * m * 2 * d * bm           # fused Wq|Wv resident
           + 2 * n * d * 4                # per-core partial out block
           + 2 * tile_n * n * 4           # att out tiles (double-buffered)
           + tile_n * 2 * d * 4           # qv temporary
           + 3 * tile_n * n * 4           # logits / e / att temporaries
           + tile_n * (n + d) * bm        # low-precision copies of att, V tile
           + n * d * 4)                   # contrib temporary
    vmem_limit = min(max(int(est * 1.5) + (8 << 20), 32 << 20),
                     _device_vmem_cap())

    def build(single_buffer_resident):
        def resident_spec(shape):
            if single_buffer_resident:
                return pl.BlockSpec(shape, lambda c, i: (0, 0),
                                    pipeline_mode=pl.Buffered(1))
            return pl.BlockSpec(shape, lambda c, i: (0, 0))

        in_specs = [
            pl.BlockSpec((tile_n, m), lambda c, i: (c * steps + i, 0)),  # x
            resident_spec((n, d)),                                       # K
            resident_spec((m, 2 * d)),                                   # Wq|Wv
        ]
        out_specs = (
            pl.BlockSpec((1, n, d), lambda c, i: (c, 0, 0)),      # partial acc
            pl.BlockSpec((tile_n, n), lambda c, i: (c * steps + i, 0)),  # att
        )
        return pl.pallas_call(
            self_attention_kernel,
            out_shape=(
                jax.ShapeDtypeStruct((num_cores, n, d), f32),  # att^T V parts
                jax.ShapeDtypeStruct((n, n), f32),             # att_weights_
            ),
            grid_spec=pltpu.PrefetchScalarGridSpec(
                num_scalar_prefetch=0,
                grid=(num_cores, steps),
                in_specs=in_specs,
                out_specs=out_specs,
            ),
            compiler_params=pltpu.CompilerParams(
                dimension_semantics=("parallel", "arbitrary"),
                vmem_limit_bytes=vmem_limit,
            ),
        )

    try:
        part_out, att = build(True)(x_in, k_full, wqv_t)
    except Exception:
        # pl.Buffered(1) not supported on this jax version; default buffering.
        part_out, att = build(False)(x_in, k_full, wqv_t)

    # Epilogue hoist: combine per-core partials and apply the output
    # projection as one dense XLA matmul.
    acc = jnp.sum(part_out, axis=0)
    y = jnp.dot(acc.astype(mxu_dtype), wo_t, preferred_element_type=f32)
    return y, att


def self_attention_ref(x, wk, wq, wv, wo):
    k = x @ wk.T
    q = (x @ wq.T) * 0.06
    v = x @ wv.T
    logits = q @ k.T
    att = jax.nn.softmax(logits, axis=-1)
    y = (v.T @ att).T          # == att.T @ v
    y = y @ wo.T
    return y, att


if __name__ == "__main__":
    # Small synthetic shapes consistent with the module: seq n=64, input_size
    # m=32, output_size=32 (real module uses 1024; same math, bigger dims).
    # tile_n=16 with num_cores=2 -> 2 cores x 2 steps, exercising the
    # parallel axis, the accumulator and both pl.when branches.
    n, m, out = 64, 32, 32

    key = jax.random.PRNGKey(0)
    kx, kk, kq, kv, ko = jax.random.split(key, 5)
    x = jax.random.normal(kx, (n, m), dtype=jnp.float32)
    # nn.Linear parameter shapes: (out_features, in_features).
    wk = jax.random.normal(kk, (out, m), dtype=jnp.float32) * (1.0 / jnp.sqrt(m))
    wq = jax.random.normal(kq, (out, m), dtype=jnp.float32) * (1.0 / jnp.sqrt(m))
    wv = jax.random.normal(kv, (out, m), dtype=jnp.float32) * (1.0 / jnp.sqrt(m))
    wo = jax.random.normal(ko, (m, out), dtype=jnp.float32) * (1.0 / jnp.sqrt(out))

    y_ref, att_ref = self_attention_ref(x, wk, wq, wv, wo)

    # 1) Exact path (f32 MXU operands): tight tolerances.
    y32, att32 = self_attention(x, wk, wq, wv, wo, tile_n=16,
                                mxu_dtype=jnp.float32)
    jax.block_until_ready((y32, att32))
    assert jnp.allclose(att32, att_ref, atol=1e-5, rtol=1e-5), "f32 att mismatch"
    assert jnp.allclose(y32, y_ref, atol=1e-4, rtol=1e-4), "f32 y mismatch"

    # 2) Performance path (bf16 MXU operands, f32 softmax/accumulate):
    #    loosened tolerances per the bf16 cast.
    y16, att16 = self_attention(x, wk, wq, wv, wo, tile_n=16)
    jax.block_until_ready((y16, att16))
    assert jnp.allclose(att16, att_ref, atol=5e-3, rtol=5e-3), "bf16 att mismatch"
    assert jnp.allclose(y16, y_ref, atol=5e-2, rtol=5e-2), "bf16 y mismatch"

    print("KERNEL_OK")
</pallas_src>

<mosaic_0001>
module attributes {stable_mosaic.version = 11 : i64} {
  func.func @self_attention_kernel(%arg0: i32, %arg1: i32, %arg2: memref<16x32xf32, #tpu.memory_space<vmem>>, %arg3: memref<64x32xf32, #tpu.memory_space<vmem>>, %arg4: memref<32x64xf32, #tpu.memory_space<vmem>>, %arg5: memref<1x64x32xf32, #tpu.memory_space<vmem>>, %arg6: memref<16x64xf32, #tpu.memory_space<vmem>>) attributes {dimension_semantics = [#tpu.dimension_semantics<parallel>, #tpu.dimension_semantics<arbitrary>], iteration_bounds = array<i64: 2, 2>, scalar_prefetch = 0 : i64, scratch_operands = 0 : i64, tpu.core_type = #tpu.core_type<tc>, window_params = [{transform_indices = @transform_0, window_bounds = array<i64: 16, 32>}, {pipeline_mode = #tpu.pipeline_mode<synchronous>, transform_indices = @transform_1, window_bounds = array<i64: 64, 32>}, {pipeline_mode = #tpu.pipeline_mode<synchronous>, transform_indices = @transform_2, window_bounds = array<i64: 32, 64>}, {transform_indices = @transform_3, window_bounds = array<i64: 1, 64, 32>}, {transform_indices = @transform_4, window_bounds = array<i64: 16, 64>}]} {
    %c0_i32 = arith.constant 0 : i32
    %0 = arith.cmpi eq, %arg1, %c0_i32 : i32
    %1 = arith.extui %0 : i1 to i32
    %c0_i32_0 = arith.constant 0 : i32
    %2 = arith.cmpi ne, %1, %c0_i32_0 : i32
    scf.if %2 {
      %cst_18 = arith.constant 0.000000e+00 : f32
      %25 = vector.broadcast %cst_18 : f32 to vector<1x64x32xf32>
      %c0_19 = arith.constant 0 : index
      %c0_20 = arith.constant 0 : index
      %c0_21 = arith.constant 0 : index
      %26 = vector.load %arg5[%c0_19, %c0_20, %c0_21] : memref<1x64x32xf32, #tpu.memory_space<vmem>>, vector<1x64x32xf32>
      tpu.vector_store %arg5[%c0_19, %c0_20, %c0_21], %25 {strides = array<i32>} : memref<1x64x32xf32, #tpu.memory_space<vmem>>, vector<1x64x32xf32>,
    } else {
    }
    %c0 = arith.constant 0 : index
    %c0_1 = arith.constant 0 : index
    %3 = vector.load %arg2[%c0, %c0_1] : memref<16x32xf32, #tpu.memory_space<vmem>>, vector<16x32xf32>
    %c0_2 = arith.constant 0 : index
    %c0_3 = arith.constant 0 : index
    %4 = vector.load %arg4[%c0_2, %c0_3] : memref<32x64xf32, #tpu.memory_space<vmem>>, vector<32x64xf32>
    %cst = arith.constant dense<0.000000e+00> : vector<16x64xf32>
    %5 = tpu.matmul %3, %4, %cst {dimension_numbers = #tpu.dot_dimension_numbers<[1], [0], [0], [1], [0, 0, 1, 1], [], []>} : vector<16x32xf32>, vector<32x64xf32>, vector<16x64xf32> -> vector<16x64xf32>
    %6 = vector.extract_strided_slice %5 {offsets = [0, 0], sizes = [16, 32], strides = [1, 1]} : vector<16x64xf32> to vector<16x32xf32>
    %7 = vector.extract_strided_slice %5 {offsets = [0, 32], sizes = [16, 32], strides = [1, 1]} : vector<16x64xf32> to vector<16x32xf32>
    %c0_4 = arith.constant 0 : index
    %c0_5 = arith.constant 0 : index
    %8 = vector.load %arg3[%c0_4, %c0_5] : memref<64x32xf32, #tpu.memory_space<vmem>>, vector<64x32xf32>
    %cst_6 = arith.constant dense<0.000000e+00> : vector<16x64xf32>
    %9 = tpu.matmul %6, %8, %cst_6 {dimension_numbers = #tpu.dot_dimension_numbers<[1], [1], [0], [0], [0, 0, 1, 0], [], []>} : vector<16x32xf32>, vector<64x32xf32>, vector<16x64xf32> -> vector<16x64xf32>
    %cst_7 = arith.constant dense<0xFF800000> : vector<16xf32>
    %10 = vector.multi_reduction <maximumf>, %9, %cst_7 [1] : vector<16x64xf32> to vector<16xf32>
    %11 = vector.shape_cast %10 : vector<16xf32> to vector<16x1xf32>
    %12 = vector.broadcast %11 : vector<16x1xf32> to vector<16x64xf32>
    %13 = arith.subf %9, %12 : vector<16x64xf32>
    %14 = math.exp %13 : vector<16x64xf32>
    %cst_8 = arith.constant dense<0.000000e+00> : vector<16xf32>
    %15 = vector.multi_reduction <add>, %14, %cst_8 [1] : vector<16x64xf32> to vector<16xf32>
    %16 = vector.shape_cast %15 : vector<16xf32> to vector<16x1xf32>
    %17 = vector.broadcast %16 : vector<16x1xf32> to vector<16x64xf32>
    %18 = arith.divf %14, %17 : vector<16x64xf32>
    %c0_9 = arith.constant 0 : index
    %c0_10 = arith.constant 0 : index
    %19 = vector.load %arg6[%c0_9, %c0_10] : memref<16x64xf32, #tpu.memory_space<vmem>>, vector<16x64xf32>
    tpu.vector_store %arg6[%c0_9, %c0_10], %18 {strides = array<i32>} : memref<16x64xf32, #tpu.memory_space<vmem>>, vector<16x64xf32>,
    %cst_11 = arith.constant dense<0.000000e+00> : vector<64x32xf32>
    %20 = tpu.matmul %18, %7, %cst_11 {dimension_numbers = #tpu.dot_dimension_numbers<[0], [0], [1], [1], [0, 1, 1, 1], [], []>} : vector<16x64xf32>, vector<16x32xf32>, vector<64x32xf32> -> vector<64x32xf32>
    %c0_12 = arith.constant 0 : index
    %c0_13 = arith.constant 0 : index
    %c0_14 = arith.constant 0 : index
    %21 = vector.load %arg5[%c0_12, %c0_13, %c0_14] : memref<1x64x32xf32, #tpu.memory_space<vmem>>, vector<1x64x32xf32>
    %22 = vector.shape_cast %20 : vector<64x32xf32> to vector<1x64x32xf32>
    %23 = arith.addf %21, %22 : vector<1x64x32xf32>
    %c0_15 = arith.constant 0 : index
    %c0_16 = arith.constant 0 : index
    %c0_17 = arith.constant 0 : index
    %24 = vector.load %arg5[%c0_15, %c0_16, %c0_17] : memref<1x64x32xf32, #tpu.memory_space<vmem>>, vector<1x64x32xf32>
    tpu.vector_store %arg5[%c0_15, %c0_16, %c0_17], %23 {strides = array<i32>} : memref<1x64x32xf32, #tpu.memory_space<vmem>>, vector<1x64x32xf32>,
    return
  }
  func.func @transform_0(%arg0: i32, %arg1: i32) -> (i32, i32) {
    %c2_i32 = arith.constant 2 : i32
    %0 = arith.muli %arg0, %c2_i32 : i32
    %1 = arith.addi %0, %arg1 : i32
    %c0_i32 = arith.constant 0 : i32
    %c0_i32_0 = arith.constant 0 : i32
    return %1, %c0_i32 : i32, i32
  }
  func.func @transform_1(%arg0: i32, %arg1: i32) -> (i32, i32) {
    %c0_i32 = arith.constant 0 : i32
    %c0_i32_0 = arith.constant 0 : i32
    %c0_i32_1 = arith.constant 0 : i32
    return %c0_i32, %c0_i32_0 : i32, i32
  }
  func.func @transform_2(%arg0: i32, %arg1: i32) -> (i32, i32) {
    %c0_i32 = arith.constant 0 : i32
    %c0_i32_0 = arith.constant 0 : i32
    %c0_i32_1 = arith.constant 0 : i32
    return %c0_i32, %c0_i32_0 : i32, i32
  }
  func.func @transform_3(%arg0: i32, %arg1: i32) -> (i32, i32, i32) {
    %c0_i32 = arith.constant 0 : i32
    %c0_i32_0 = arith.constant 0 : i32
    %c0_i32_1 = arith.constant 0 : i32
    return %arg0, %c0_i32, %c0_i32_0 : i32, i32, i32
  }
  func.func @transform_4(%arg0: i32, %arg1: i32) -> (i32, i32) {
    %c2_i32 = arith.constant 2 : i32
    %0 = arith.muli %arg0, %c2_i32 : i32
    %1 = arith.addi %0, %arg1 : i32
    %c0_i32 = arith.constant 0 : i32
    %c0_i32_0 = arith.constant 0 : i32
    return %1, %c0_i32 : i32, i32
  }
}

module attributes {stable_mosaic.version = 11 : i64} {
  func.func @self_attention_kernel(%arg0: i32, %arg1: i32, %arg2: memref<16x32xf32, #tpu.memory_space<vmem>>, %arg3: memref<64x32xf32, #tpu.memory_space<vmem>>, %arg4: memref<32x64xf32, #tpu.memory_space<vmem>>, %arg5: memref<1x64x32xf32, #tpu.memory_space<vmem>>, %arg6: memref<16x64xf32, #tpu.memory_space<vmem>>) attributes {dimension_semantics = [#tpu.dimension_semantics<parallel>, #tpu.dimension_semantics<arbitrary>], iteration_bounds = array<i64: 2, 2>, scalar_prefetch = 0 : i64, scratch_operands = 0 : i64, tpu.core_type = #tpu.core_type<tc>, window_params = [{transform_indices = @transform_0, window_bounds = array<i64: 16, 32>}, {pipeline_mode = #tpu.pipeline_mode<synchronous>, transform_indices = @transform_1, window_bounds = array<i64: 64, 32>}, {pipeline_mode = #tpu.pipeline_mode<synchronous>, transform_indices = @transform_2, window_bounds = array<i64: 32, 64>}, {transform_indices = @transform_3, window_bounds = array<i64: 1, 64, 32>}, {transform_indices = @transform_4, window_bounds = array<i64: 16, 64>}]} {
    %c0_i32 = arith.constant 0 : i32
    %0 = arith.cmpi eq, %arg1, %c0_i32 : i32
    %1 = arith.extui %0 : i1 to i32
    %c0_i32_0 = arith.constant 0 : i32
    %2 = arith.cmpi ne, %1, %c0_i32_0 : i32
    scf.if %2 {
      %cst_18 = arith.constant 0.000000e+00 : f32
      %25 = vector.broadcast %cst_18 : f32 to vector<1x64x32xf32>
      %c0_19 = arith.constant 0 : index
      %c0_20 = arith.constant 0 : index
      %c0_21 = arith.constant 0 : index
      %26 = vector.load %arg5[%c0_19, %c0_20, %c0_21] : memref<1x64x32xf32, #tpu.memory_space<vmem>>, vector<1x64x32xf32>
      tpu.vector_store %arg5[%c0_19, %c0_20, %c0_21], %25 {strides = array<i32>} : memref<1x64x32xf32, #tpu.memory_space<vmem>>, vector<1x64x32xf32>,
    } else {
    }
    %c0 = arith.constant 0 : index
    %c0_1 = arith.constant 0 : index
    %3 = vector.load %arg2[%c0, %c0_1] : memref<16x32xf32, #tpu.memory_space<vmem>>, vector<16x32xf32>
    %c0_2 = arith.constant 0 : index
    %c0_3 = arith.constant 0 : index
    %4 = vector.load %arg4[%c0_2, %c0_3] : memref<32x64xf32, #tpu.memory_space<vmem>>, vector<32x64xf32>
    %cst = arith.constant dense<0.000000e+00> : vector<16x64xf32>
    %5 = tpu.matmul %3, %4, %cst {dimension_numbers = #tpu.dot_dimension_numbers<[1], [0], [0], [1], [0, 0, 1, 1], [], []>} : vector<16x32xf32>, vector<32x64xf32>, vector<16x64xf32> -> vector<16x64xf32>
    %6 = vector.extract_strided_slice %5 {offsets = [0, 0], sizes = [16, 32], strides = [1, 1]} : vector<16x64xf32> to vector<16x32xf32>
    %7 = vector.extract_strided_slice %5 {offsets = [0, 32], sizes = [16, 32], strides = [1, 1]} : vector<16x64xf32> to vector<16x32xf32>
    %c0_4 = arith.constant 0 : index
    %c0_5 = arith.constant 0 : index
    %8 = vector.load %arg3[%c0_4, %c0_5] : memref<64x32xf32, #tpu.memory_space<vmem>>, vector<64x32xf32>
    %cst_6 = arith.constant dense<0.000000e+00> : vector<16x64xf32>
    %9 = tpu.matmul %6, %8, %cst_6 {dimension_numbers = #tpu.dot_dimension_numbers<[1], [1], [0], [0], [0, 0, 1, 0], [], []>} : vector<16x32xf32>, vector<64x32xf32>, vector<16x64xf32> -> vector<16x64xf32>
    %cst_7 = arith.constant dense<0xFF800000> : vector<16xf32>
    %10 = vector.multi_reduction <maximumf>, %9, %cst_7 [1] : vector<16x64xf32> to vector<16xf32>
    %11 = vector.shape_cast %10 : vector<16xf32> to vector<16x1xf32>
    %12 = vector.broadcast %11 : vector<16x1xf32> to vector<16x64xf32>
    %13 = arith.subf %9, %12 : vector<16x64xf32>
    %14 = math.exp %13 : vector<16x64xf32>
    %cst_8 = arith.constant dense<0.000000e+00> : vector<16xf32>
    %15 = vector.multi_reduction <add>, %14, %cst_8 [1] : vector<16x64xf32> to vector<16xf32>
    %16 = vector.shape_cast %15 : vector<16xf32> to vector<16x1xf32>
    %17 = vector.broadcast %16 : vector<16x1xf32> to vector<16x64xf32>
    %18 = arith.divf %14, %17 : vector<16x64xf32>
    %c0_9 = arith.constant 0 : index
    %c0_10 = arith.constant 0 : index
    %19 = vector.load %arg6[%c0_9, %c0_10] : memref<16x64xf32, #tpu.memory_space<vmem>>, vector<16x64xf32>
    tpu.vector_store %arg6[%c0_9, %c0_10], %18 {strides = array<i32>} : memref<16x64xf32, #tpu.memory_space<vmem>>, vector<16x64xf32>,
    %cst_11 = arith.constant dense<0.000000e+00> : vector<64x32xf32>
    %20 = tpu.matmul %18, %7, %cst_11 {dimension_numbers = #tpu.dot_dimension_numbers<[0], [0], [1], [1], [0, 1, 1, 1], [], []>} : vector<16x64xf32>, vector<16x32xf32>, vector<64x32xf32> -> vector<64x32xf32>
    %c0_12 = arith.constant 0 : index
    %c0_13 = arith.constant 0 : index
    %c0_14 = arith.constant 0 : index
    %21 = vector.load %arg5[%c0_12, %c0_13, %c0_14] : memref<1x64x32xf32, #tpu.memory_space<vmem>>, vector<1x64x32xf32>
    %22 = vector.shape_cast %20 : vector<64x32xf32> to vector<1x64x32xf32>
    %23 = arith.addf %21, %22 : vector<1x64x32xf32>
    %c0_15 = arith.constant 0 : index
    %c0_16 = arith.constant 0 : index
    %c0_17 = arith.constant 0 : index
    %24 = vector.load %arg5[%c0_15, %c0_16, %c0_17] : memref<1x64x32xf32, #tpu.memory_space<vmem>>, vector<1x64x32xf32>
    tpu.vector_store %arg5[%c0_15, %c0_16, %c0_17], %23 {strides = array<i32>} : memref<1x64x32xf32, #tpu.memory_space<vmem>>, vector<1x64x32xf32>,
    return
  }
  func.func @transform_0(%arg0: i32, %arg1: i32) -> (i32, i32) {
    %c2_i32 = arith.constant 2 : i32
    %0 = arith.muli %arg0, %c2_i32 : i32
    %1 = arith.addi %0, %arg1 : i32
    %c0_i32 = arith.constant 0 : i32
    %c0_i32_0 = arith.constant 0 : i32
    return %1, %c0_i32 : i32, i32
  }
  func.func @transform_1(%arg0: i32, %arg1: i32) -> (i32, i32) {
    %c0_i32 = arith.constant 0 : i32
    %c0_i32_0 = arith.constant 0 : i32
    %c0_i32_1 = arith.constant 0 : i32
    return %c0_i32, %c0_i32_0 : i32, i32
  }
  func.func @transform_2(%arg0: i32, %arg1: i32) -> (i32, i32) {
    %c0_i32 = arith.constant 0 : i32
    %c0_i32_0 = arith.constant 0 : i32
    %c0_i32_1 = arith.constant 0 : i32
    return %c0_i32, %c0_i32_0 : i32, i32
  }
  func.func @transform_3(%arg0: i32, %arg1: i32) -> (i32, i32, i32) {
    %c0_i32 = arith.constant 0 : i32
    %c0_i32_0 = arith.constant 0 : i32
    %c0_i32_1 = arith.constant 0 : i32
    return %arg0, %c0_i32, %c0_i32_0 : i32, i32, i32
  }
  func.func @transform_4(%arg0: i32, %arg1: i32) -> (i32, i32) {
    %c2_i32 = arith.constant 2 : i32
    %0 = arith.muli %arg0, %c2_i32 : i32
    %1 = arith.addi %0, %arg1 : i32
    %c0_i32 = arith.constant 0 : i32
    %c0_i32_0 = arith.constant 0 : i32
    return %1, %c0_i32 : i32, i32
  }
}

</mosaic_0001>

<bundles_post_ra>
// kernel: tpu_custom_call.1
= control target key start
LH: loop header
LB: loop body
LE: loop exit
PB: predicated region body
PF: predicated region fallthrough
CT: control target
= control target key end

     0   :  { %10 = vsyncpa [#allocation3], 0  ;;  %s1385_s0 = inlined_call_operand.vmem [shape: f32[64,32], index: 0, kind: input, shape index: {}]   ;;  %s1386_s1 = inlined_call_operand.vmem [shape: f32[64,32], index: 1, kind: input, shape index: {}]   ;;  %s1387_s2 = inlined_call_operand.vmem [shape: f32[32,64], index: 2, kind: input, shape index: {}]   ;;  %s1388_s3 = inlined_call_operand.vmem [shape: f32[2,64,32], index: 3, kind: output, shape index: {0}]   ;;  %s1389_s4 = inlined_call_operand.hbm [shape: f32[64,64], index: 4, kind: output, shape index: {1}]  }
   0x1   :  { %12 = vsyncpa [#allocation3 + $0x1], 0  ;;  %s1123_s15 = smov 0   ;;  %s1125_s16 = smov 0  }
   0x2   :  { %s1127_s17 = smov 0   ;;  %s1129_s18 = smov 0  }
   0x3   :  { %s1131_s19 = smov 0   ;;  %s1133_s20 = smov 0  }
   0x4   :  { %s1135_s21 = smov 0   ;;  %s1137_s22 = smov 0  }
   0x5 LB: > { %s799_s23 = sadd.s32 4294967295, %s1091_s22   ;;  %s27_s24 = sadd.s32 1, %s1083_s20  ;;  %s1091_s22 = sphi %s1137_s22, %s18_s22   ;;  %s1087_s21 = sphi %s1135_s21, %s1398_s21   ;;  %s1083_s20 = sphi %s1133_s20, %s1397_s20   ;;  %s1079_s19 = sphi %s1131_s19, %s1396_s19   ;;  %s1075_s18 = sphi %s1129_s18, %s1395_s18   ;;  %s1071_s17 = sphi %s1127_s17, %s1394_s17   ;;  %s1067_s16 = sphi %s1125_s16, %s1393_s16   ;;  %s1063_s15 = sphi %s1123_s15, %s1392_s15  }
   0x6   : > { %s30_s25 = sadd.s32 1, %s1087_s21  ;;  %p28_p0 = scmp.ge.s32.totalorder %s27_s24, 2 }
   0x7   : > { %s803_s26 = sshll.u32 %s1087_s21, 1  ;;  %s800_s27 = sadd.s32 4294967294, %s1091_s22  }
   0x8   : > { %s133_s28 = sadd.s32 %s1083_s20, %s803_s26  ;;  %s1400_s24 = smov (%p28_p0, %s27_s24), 0 }
   0x9   : > { %s1402_s25 = smov (!%p28_p0, %s30_s25), %s1087_s21  ;;  %p149_p1 = scmp.ne.s32.totalorder %s1071_s17, %s1067_s16 }
   0xa   : > { %p150_p2 = scmp.eq.s32.totalorder %s799_s23, 3  ;;  %p32_p3 = scmp.ge.s32.totalorder %s1402_s25, 2 }
   0xb   : > { %p155_p4 = scmp.ne.s32.totalorder %s1067_s16, %s1063_s15  ;;  %p156_p6 = scmp.eq.s32.totalorder %s800_s27, 3 }
   0xc   : > { %p1176_p5 = por %p150_p2, %p149_p1  ;;  %s1404_s25 = smov (%p32_p3, %s1402_s25), 0 }
   0xd   : > { %p1182_p7 = por %p156_p6, %p155_p4  ;;  %p807_p8 = scmp.ge.s32.totalorder %s1091_s22, 1 }
   0xe   : > { %s804_s5 = sshll.u32 %s1404_s25, 1  ;;  %p193_p9 = scmp.lt.s32.totalorder %s1091_s22, 5 }
   0xf   : > { %s135_s6 = sadd.s32 %s804_s5, %s1400_s24  ;;  %s139_s7 = sadd.s32 1, %s1071_s17 }
  0x10   : > { %s136_s8 = ssub.s32 %s133_s28, %s135_s6  ;;  %p194_p10 = pnand %p807_p8, %p193_p9 }
  0x11   : > { %p137_p11 = scmp.eq.s32.totalorder %s136_s8, 0  ;;  %s223_s10 = sand.u32 (!%p194_p10), 1, %s1067_s16  }
  0x12   : > { %197 = sbr.rel (%p194_p10) target bundleno = 1099 (0x44b), region = 32  ;;  %s809_s11 = sshll.u32 (!%p194_p10), %s1079_s19, 1 }
  0x13   : > { %s1192_s9 = scalar_select %p137_p11, %s1071_s17, %s139_s7  }
  0x14   : > { %s808_s12 = sshll.u32 (!%p194_p10), %s223_s10, 4  ;;  %s1199_s13 = sadd.s32 (!%p194_p10), %s1075_s18, %s809_s11 }
  0x15   : > { %s810_s14 = sshll.u32 (!%p194_p10), %s1199_s13, 1  ;;  %p236_p13 = scmp.lt.s32.totalorder (!%p194_p10), %s1079_s19, 1 }
  0x16   : > { %p229_p12 = scmp.lt.s32.totalorder (!%p194_p10), %s810_s14, 7  ;;  %s1214_s11 = scalar_lea.vmem (!%p194_p10), [#allocation2], %s808_s12 }
  0x17   : > { %s1408_s19 = smov (!%p236_p13, %s1079_s19), 1  ;;  %p814_p0 = scmp.ne.s32.totalorder %s1075_s18, 0 }
  0x18   : > { %s1406_s14 = smov (!%p229_p12, %s810_s14), 7  ;;  %s841_s5 = sshll.u32 %s1408_s19, 6 }
  0x19   : > { %s811_s23 = sshll.u32 %s1406_s14, 3  ;;  %s1212_s8 = scalar_lea.vmem %s1388_s3, %s841_s5 }
  0x1a   : > { %s1207_s28 = scalar_lea.vmem %s1385_s0, %s811_s23  ;;  %247 = sbr.rel (%p814_p0) target bundleno = 36 (0x24), region = 36 }
  0x1f   : > { %vm248_vm0 = vcmask 261120   ;;  %v1093_v0 = vmov 0.0  }
  0x20   : > { %249 = vst.msk [vmem:[%s1212_s8] sm:$0xff] %vm248_vm0, %v1093_v0  ;;  %250 = vst.msk [vmem:[%s1212_s8 + $0x8] sm:$0xff] %vm248_vm0, %v1093_v0 }
  0x21   : > { %251 = vst.msk [vmem:[%s1212_s8 + $0x10] sm:$0xff] %vm248_vm0, %v1093_v0  ;;  %252 = vst.msk [vmem:[%s1212_s8 + $0x18] sm:$0xff] %vm248_vm0, %v1093_v0 }
  0x22   : > { %253 = vst.msk [vmem:[%s1212_s8 + $0x20] sm:$0xff] %vm248_vm0, %v1093_v0  ;;  %254 = vst.msk [vmem:[%s1212_s8 + $0x28] sm:$0xff] %vm248_vm0, %v1093_v0 }
  0x23   : > { %255 = vst.msk [vmem:[%s1212_s8 + $0x30] sm:$0xff] %vm248_vm0, %v1093_v0  ;;  %256 = vst.msk [vmem:[%s1212_s8 + $0x38] sm:$0xff] %vm248_vm0, %v1093_v0 }
  0x24 PF: > { %v262_v1 = vld [vmem:[%s1387_s2 + $0x18] sm:$0xff]  ;;  %v261_v2 = vld [vmem:[%s1387_s2 + $0x10] sm:$0xff]  ;;  %vm263_vm1 = vcmask 261120   ;;  %v257_v3 = vld [vmem:[%s1207_s28] sm:$0xff]  ;;  %vm458_vm2 = vcmask 523264   ;;  %s1094_s14 = smov 96  }
  0x25   : > { %869 = vmatprep.subr.mxu0 %v262_v1  ;;  %v260_v4 = vld [vmem:[%s1387_s2 + $0x8] sm:$0xff]  ;;  %877 = vmatprep.mubr.msk.f32.mxu0 %vm263_vm1, %v257_v3  ;;  %v352_v5 = vld [vmem:[%s1386_s1 + $0x38] sm:$0xff]  ;;  %v351_v6 = vld [vmem:[%s1386_s1 + $0x30] sm:$0xff]  ;;  %vm521_vm3 = vcmask 130048   ;;  %s842_s23 = sshll.u32 %s1199_s13, 8  ;;  %s699_s26 = sshll.u32 %s1214_s11, 4  ;;  %s1306_s26 = int_to_ptr.vmem [resolvable:$true] %s699_s26 }
  0x26   : > { %870 = vmatpush3.msra.mxu0 %v262_v1  ;;  %880 = vmatprep.subr.msk.mxu1 %vm263_vm1, %v352_v5  ;;  %v259_v7 = vld [vmem:[%s1387_s2] sm:$0xff]  ;;  %v258_v8 = vld [vmem:[%s1207_s28 + $0x8] sm:$0xff]  ;;  %v348_v11 = vld [vmem:[%s1386_s1 + $0x18] sm:$0xff]  ;;  %s1304_s5 = scalar_lea.hbm %s1389_s4, %s842_s23  ;;  %s1310_s6 = scalar_lea.sflag [#allocation3], %s223_s10 }
  0x27   : > { %871 = vmatprep.subr.mxu0 %v261_v2  ;;  %881 = vmatpush3.xpose.msk.msra.mxu1 %vm263_vm1, %v352_v5  ;;  %v350_v9 = vld [vmem:[%s1386_s1 + $0x28] sm:$0xff]  ;;  %v349_v10 = vld [vmem:[%s1386_s1 + $0x20] sm:$0xff]  ;;  %v347_v12 = vld [vmem:[%s1386_s1 + $0x10] sm:$0xff]  ;;  %s999_s7 = scalar_lea.vmem %s1306_s26, 256  ;;  %s1095_s13 = smov [#allocation2]  }
  0x28   : > { %872 = vmatpush3.msra.mxu0 %v261_v2  ;;  %882 = vmatprep.subr.msk.mxu1 %vm263_vm1, %v351_v6  ;;  %v346_v13 = vld [vmem:[%s1386_s1 + $0x8] sm:$0xff]  ;;  %v345_v14 = vld [vmem:[%s1386_s1] sm:$0xff]  ;;  %p1000_p1 = scmp.ne.s32.totalorder %s1306_s26, %s999_s7 }
  0x29   : > { %873 = vmatprep.subr.mxu0 %v260_v4 }
  0x2a   : > { %874 = vmatpush3.msra.mxu0 %v260_v4  ;;  %p1001_p2 = pnand %p1000_p1, %p1176_p5 }
  0x2b   : > { %875 = vmatprep.subr.mxu0 %v259_v7  ;;  %883 = vmatpush3.xpose.msk.msra.mxu1 %vm263_vm1, %v351_v6 }
  0x2c   : > { %876 = vmatpush3.msra.mxu0 %v259_v7  ;;  %884 = vmatprep.subr.msk.mxu1 %vm263_vm1, %v350_v9  ;;  %p1002_p3 = pneg %p1001_p2 }
  0x2d   : > { %878 = vmatmul.mubr.msk.f32.vlgmr.msra.gmra.mxu0 %vm263_vm1, %v258_v8 }
  0x2f   : > { %885 = vmatpush3.xpose.msk.msra.mxu1 %vm263_vm1, %v350_v9 }
  0x30   : > { %886 = vmatprep.subr.msk.mxu1 %vm263_vm1, %v349_v10 }
  0x33   : > { %887 = vmatpush3.xpose.msk.msra.mxu1 %vm263_vm1, %v349_v10 }
  0x34   : > { %888 = vmatprep.subr.msk.mxu1 %vm263_vm1, %v348_v11 }
  0x37   : > { %889 = vmatpush3.xpose.msk.msra.mxu1 %vm263_vm1, %v348_v11 }
  0x38   : > { %890 = vmatprep.subr.msk.mxu1 %vm263_vm1, %v347_v12 }
  0x3b   : > { %891 = vmatpush3.xpose.msk.msra.mxu1 %vm263_vm1, %v347_v12 }
  0x3c   : > { %892 = vmatprep.subr.msk.mxu1 %vm263_vm1, %v346_v13 }
  0x3f   : > { %893 = vmatpush3.xpose.msk.msra.mxu1 %vm263_vm1, %v346_v13 }
  0x40   : > { %894 = vmatprep.subr.msk.mxu1 %vm263_vm1, %v345_v14 }
  0x43   : > { %895 = vmatpush3.xpose.msk.msra.mxu1 %vm263_vm1, %v345_v14 }
  0xed   : > { %v879_v15 = vpop.f32.mrf.mxu0 }
  0xef   : > { %v336_v16 = vpop.f32.mrf.mxu0 }
  0xf0   : > { %896 = vmatprep.mubr.msk.f32.mxu1 %vm263_vm1, %v336_v16 }
  0xf1   : > { %897 = vmatmul.mubr.msk.f32.vlgmr.msra.gmra.mxu1 %vm263_vm1, %v879_v15 }
 0x1b1   : > { %v898_v17 = vpop.f32.mrf.mxu1 }
 0x1b2   : > { %v462_v20 = vsel %vm458_vm2, %v898_v17, -inf }
 0x1b3   : > { %v449_v18 = vpop.f32.mrf.mxu1 }
 0x1b4   : > { %v459_v19 = vsel %vm458_vm2, %v449_v18, -inf }
 0x1b5   : > { %460 = vmax.xlane.f32.xlu0 %v459_v19 }
 0x1b9   : > { %463 = vmax.xlane.f32.xlu0 %v462_v20 }
 0x1cf   : > { %517 = vrot.lane.b32.xlu0 %v879_v15, %s1094_s14 }
 0x23e   : > { %v461_v21 = vpop.xlane.xlu0 %460 }
 0x23f   : > { %v465_v22 = vsub.f32 %v449_v18, %v461_v21 }
 0x241   : > { %v467_v23 = vmul.f32 1.442695, %v465_v22 }
 0x242   : > { %v464_v24 = vpop.xlane.xlu0 %463 }
 0x243   : > { %991 = vpow2.f32 %v467_v23  ;;  %v466_v25 = vsub.f32 %v898_v17, %v464_v24 }
 0x245   : > { %v469_v26 = vmul.f32 1.442695, %v466_v25 }
 0x246   : > { %v518_v27 = vpop.permute.xlu0 %517 }
 0x247   : > { %993 = vpow2.f32 %v469_v26  ;;  %899 = vmatprep.subr.mxu0 %v518_v27 }
 0x248   : > { %900 = vmatpush3.msra.mxu0 %v518_v27 }
 0x250   : > { %v992_v28 = vpop.eup %991 }
 0x251   : > { %v471_v29 = vsel %vm458_vm2, %v992_v28, 0.0 }
 0x252   : > { %472 = vadd.xlane.f32.xlu1 %v471_v29 }
 0x254   : > { %v994_v30 = vpop.eup %993 }
 0x255   : > { %v474_v31 = vsel %vm458_vm2, %v994_v30, 0.0 }
 0x256   : > { %475 = vadd.xlane.f32.xlu1 %v474_v31 }
 0x267   : > { %515 = vrot.lane.b32.xlu1 %v336_v16, %s1094_s14 }
 0x2db   : > { %v473_v32 = vpop.xlane.xlu1 %472 }
 0x2dc   : > { %995 = vrcp.f32 %v473_v32 }
 0x2df   : > { %v476_v33 = vpop.xlane.xlu1 %475 }
 0x2e0   : > { %997 = vrcp.f32 %v476_v33 }
 0x2e3   : > { %v516_v34 = vpop.permute.xlu1 %515 }
 0x2e4   : > { %901 = vmatprep.subr.mxu0 %v516_v34 }
 0x2e5   : > { %902 = vmatpush3.msra.mxu0 %v516_v34 }
 0x2e9   : > { %v996_v35 = vpop.eup %995 }
 0x2ea   : > { %v478_v36 = vmul.f32 %v996_v35, %v992_v28 }
 0x2ec   : > { %481 = vst.msk [vmem:[%s1214_s11] sm:$0xff] %vm458_vm2, %v478_v36  ;;  %483 = vxpose.xlu1.b32.start [1/2] (short) (narrow) %v478_v36, 64 }
 0x2ed   : > { %v998_v37 = vpop.eup %997 }
 0x2ee   : > { %v480_v38 = vmul.f32 %v998_v37, %v994_v30 }
 0x2f0   : > { %484 = vxpose.xlu1.b32.end [2/2] (short) (narrow) %v480_v38, 64  ;;  %482 = vst.msk [vmem:[%s1214_s11 + $0x8] sm:$0xff] %vm458_vm2, %v480_v38  ;;  %s1003_s11 = sshll.u32 %s1095_s13, 4  ;;  %s1004_s11 = int_to_ptr.vmem [resolvable:$false] %s1003_s11 }
 0x2f1   : > { %s1005_s18 = scalar_lea.vmem %s1004_s11, 512  ;;  %p1006_p4 = scmp.lt.s32.totalorder %s1306_s26, %s1004_s11 }
 0x2f2   : > { %p1007_p6 = scmp.lt.s32.totalorder %s1005_s18, %s999_s7 }
 0x2f4   : > { %p1008_p8 = por %p1007_p6, %p1006_p4 }
 0x2f6   : > { %p1009_p9 = pnand %p1008_p8, %p1002_p3 }
 0x368   : > { %v499_v39 = vpop.trf.xlu1 }
 0x369   : > { %903 = vmatprep.mubr.msk.f32.mxu0 %vm521_vm3, %v499_v39 }
 0x36c   : > { %v500_v40 = vpop.trf.xlu1 }
 0x36d   : > { %904 = vmatmul.mubr.msk.f32.vlgmr.msra.gmra.mxu0 %vm521_vm3, %v500_v40 }
 0x370   : > { %v501_v41 = vpop.trf.xlu1 }
 0x371   : > { %906 = vmatprep.mubr.msk.f32.mxu0 %vm521_vm3, %v501_v41 }
 0x374   : > { %v502_v42 = vpop.trf.xlu1 }
 0x375   : > { %907 = vmatmul.mubr.msk.f32.gmra.mxu0 %vm521_vm3, %v502_v42 }
 0x378   : > { %v503_v43 = vpop.trf.xlu1 }
 0x379   : > { %909 = vmatprep.mubr.msk.f32.mxu0 %vm521_vm3, %v503_v43 }
 0x37c   : > { %v504_v44 = vpop.trf.xlu1 }
 0x37d   : > { %910 = vmatmul.mubr.msk.f32.gmra.mxu0 %vm521_vm3, %v504_v44 }
 0x380   : > { %v505_v45 = vpop.trf.xlu1 }
 0x381   : > { %912 = vmatprep.mubr.msk.f32.mxu0 %vm521_vm3, %v505_v45 }
 0x384   : > { %v506_v46 = vpop.trf.xlu1 }
 0x385   : > { %913 = vmatmul.mubr.msk.f32.gmra.mxu0 %vm521_vm3, %v506_v46 }
 0x386   : > { %1012 = shalt.err (!%p1009_p9)
}
 0x387   : > { %s1013_s10 = scalar_lea.hbm %s1304_s5, 256  ;;  %s1017_s14 = scalar_lea.hbm %s1389_s4, 1024 }
 0x388   : > { %p1014_p10 = scmp.ne.s32.totalorder %s1304_s5, %s1013_s10  ;;  %p1018_p13 = scmp.lt.s32.totalorder %s1304_s5, %s1389_s4 }
 0x389   : > { %p1019_p0 = scmp.lt.s32.totalorder %s1017_s14, %s1013_s10 }
 0x38a   : > { %p1015_p11 = pnand %p1014_p10, %p1176_p5 }
 0x38b   : > { %p1020_p1 = por %p1019_p0, %p1018_p13 }
 0x38c   : > { %p1016_p12 = pneg %p1015_p11 }
 0x38e   : > { %p1021_p2 = pnand %p1020_p1, %p1016_p12 }
 0x390   : > { %1024 = shalt.err (!%p1021_p2)
}
 0x391   : > { %s1096_s27 = smov 128   ;;  %s1097_s7 = smov 8   ;;  %v652_v47 = vld [vmem:[%s1212_s8 + $0x8] sm:$0xff]  ;;  %v651_v49 = vld [vmem:[%s1212_s8] sm:$0xff]  ;;  %v654_v53 = vld [vmem:[%s1212_s8 + $0x18] sm:$0xff] }
 0x392   : > { %915 = dma.vmem_to_hbm [thread:$0]  (%p1176_p5), %s1306_s26, 256, %s1304_s5, %s1310_s6, %s1096_s27, %s1096_s27, %s1097_s7  }
 0x393   : > { %v653_v55 = vld [vmem:[%s1212_s8 + $0x10] sm:$0xff]  ;;  %v656_v59 = vld [vmem:[%s1212_s8 + $0x28] sm:$0xff]  ;;  %v655_v61 = vld [vmem:[%s1212_s8 + $0x20] sm:$0xff] }
 0x394   : > { %v658_v1 = vld [vmem:[%s1212_s8 + $0x38] sm:$0xff]  ;;  %v657_v3 = vld [vmem:[%s1212_s8 + $0x30] sm:$0xff] }
 0x42d   : > { %v905_v48 = vpop.f32.mrf.mxu0 }
 0x42e   : > { %v660_v50 = vadd.f32 %v905_v48, %v652_v47 }
 0x42f   : > { %v612_v51 = vpop.f32.mrf.mxu0 }
 0x430   : > { %668 = vst.msk [vmem:[%s1212_s8 + $0x8] sm:$0xff] %vm263_vm1, %v660_v50  ;;  %v659_v52 = vadd.f32 %v651_v49, %v612_v51 }
 0x432   : > { %667 = vst.msk [vmem:[%s1212_s8] sm:$0xff] %vm263_vm1, %v659_v52 }
 0x435   : > { %v908_v54 = vpop.f32.mrf.mxu0 }
 0x436   : > { %v662_v56 = vadd.f32 %v908_v54, %v654_v53 }
 0x437   : > { %v622_v57 = vpop.f32.mrf.mxu0 }
 0x438   : > { %670 = vst.msk [vmem:[%s1212_s8 + $0x18] sm:$0xff] %vm263_vm1, %v662_v56  ;;  %v661_v58 = vadd.f32 %v653_v55, %v622_v57 }
 0x43a   : > { %669 = vst.msk [vmem:[%s1212_s8 + $0x10] sm:$0xff] %vm263_vm1, %v661_v58 }
 0x43d   : > { %v911_v60 = vpop.f32.mrf.mxu0 }
 0x43e   : > { %v664_v62 = vadd.f32 %v911_v60, %v656_v59 }
 0x43f   : > { %v632_v63 = vpop.f32.mrf.mxu0 }
 0x440   : > { %672 = vst.msk [vmem:[%s1212_s8 + $0x28] sm:$0xff] %vm263_vm1, %v664_v62  ;;  %v663_v0 = vadd.f32 %v655_v61, %v632_v63 }
 0x442   : > { %671 = vst.msk [vmem:[%s1212_s8 + $0x20] sm:$0xff] %vm263_vm1, %v663_v0 }
 0x445   : > { %v914_v2 = vpop.f32.mrf.mxu0 }
 0x446   : > { %v666_v4 = vadd.f32 %v914_v2, %v658_v1 }
 0x447   : > { %v642_v5 = vpop.f32.mrf.mxu0 }
 0x448   : > { %674 = vst.msk [vmem:[%s1212_s8 + $0x38] sm:$0xff] %vm263_vm1, %v666_v4  ;;  %v665_v6 = vadd.f32 %v657_v3, %v642_v5 }
 0x44a   : > { %673 = vst.msk [vmem:[%s1212_s8 + $0x30] sm:$0xff] %vm263_vm1, %v665_v6 }
 0x44b PF: > { %p921_p5 = scmp.ge.s32.totalorder %s1091_s22, 2  ;;  %s722_s29 = sand.u32 1, %s1063_s15  }
 0x44c   : > { %s723_s26 = scalar_lea.sflag [#allocation3], %s722_s29 }
 0x44d   : > { %p918_p3 = pnand %p921_p5, %p1182_p7 }
 0x44f   : > { %p919_p4 = pneg %p918_p3 }
 0x451   : > { %1058 = dma.done.wait (%p919_p4), %s723_s26, 256  }
 0x452   : > { %1060 = vsyncadd (%p919_p4), %s723_s26, 4294967040  ;;  %s18_s22 = sadd.s32 1, %s1091_s22   ;;  %s1392_s15 = smov %s1067_s16 }
 0x453   : > { %p15_p6 = scmp.ge.s32.totalorder %s18_s22, 6   ;;  %s1393_s16 = smov %s1071_s17 }
 0x454   : > { %s1394_s17 = smov %s1192_s9  ;;  %s1395_s18 = smov %s1083_s20 }
 0x455   : > { %s1396_s19 = smov %s1087_s21  ;;  %s1397_s20 = smov %s1400_s24 }
 0x456   : > { %s1398_s21 = smov %s1404_s25  ;;  %17 = sbr.rel (!%p15_p6) target bundleno = 5 (0x5), region = 83 }
 0x45b   :  { %728 = vsyncpa [#allocation3], 1 }
 0x45c   :  { %730 = vsyncpa [#allocation3 + $0x1], 1 }

// kernel: tpu_custom_call.1
= control target key start
LH: loop header
LB: loop body
LE: loop exit
PB: predicated region body
PF: predicated region fallthrough
CT: control target
= control target key end

     0   :  { %10 = vsyncpa [#allocation3], 0  ;;  %s1385_s0 = inlined_call_operand.vmem [shape: f32[64,32], index: 0, kind: input, shape index: {}]   ;;  %s1386_s1 = inlined_call_operand.vmem [shape: f32[64,32], index: 1, kind: input, shape index: {}]   ;;  %s1387_s2 = inlined_call_operand.vmem [shape: f32[32,64], index: 2, kind: input, shape index: {}]   ;;  %s1388_s3 = inlined_call_operand.vmem [shape: f32[2,64,32], index: 3, kind: output, shape index: {0}]   ;;  %s1389_s4 = inlined_call_operand.hbm [shape: f32[64,64], index: 4, kind: output, shape index: {1}]  }
   0x1   :  { %12 = vsyncpa [#allocation3 + $0x1], 0  ;;  %s1123_s15 = smov 0   ;;  %s1125_s16 = smov 0  }
   0x2   :  { %s1127_s17 = smov 0   ;;  %s1129_s18 = smov 0  }
   0x3   :  { %s1131_s19 = smov 0   ;;  %s1133_s20 = smov 0  }
   0x4   :  { %s1135_s21 = smov 0   ;;  %s1137_s22 = smov 0  }
   0x5 LB: > { %s799_s23 = sadd.s32 4294967295, %s1091_s22   ;;  %s27_s24 = sadd.s32 1, %s1083_s20  ;;  %s1091_s22 = sphi %s1137_s22, %s18_s22   ;;  %s1087_s21 = sphi %s1135_s21, %s1398_s21   ;;  %s1083_s20 = sphi %s1133_s20, %s1397_s20   ;;  %s1079_s19 = sphi %s1131_s19, %s1396_s19   ;;  %s1075_s18 = sphi %s1129_s18, %s1395_s18   ;;  %s1071_s17 = sphi %s1127_s17, %s1394_s17   ;;  %s1067_s16 = sphi %s1125_s16, %s1393_s16   ;;  %s1063_s15 = sphi %s1123_s15, %s1392_s15  }
   0x6   : > { %s30_s25 = sadd.s32 1, %s1087_s21  ;;  %p28_p0 = scmp.ge.s32.totalorder %s27_s24, 2 }
   0x7   : > { %s803_s26 = sshll.u32 %s1087_s21, 1  ;;  %s800_s27 = sadd.s32 4294967294, %s1091_s22  }
   0x8   : > { %s133_s28 = sadd.s32 %s1083_s20, %s803_s26  ;;  %s1400_s24 = smov (%p28_p0, %s27_s24), 0 }
   0x9   : > { %s1402_s25 = smov (!%p28_p0, %s30_s25), %s1087_s21  ;;  %p149_p1 = scmp.ne.s32.totalorder %s1071_s17, %s1067_s16 }
   0xa   : > { %p150_p2 = scmp.eq.s32.totalorder %s799_s23, 3  ;;  %p32_p3 = scmp.ge.s32.totalorder %s1402_s25, 2 }
   0xb   : > { %p155_p4 = scmp.ne.s32.totalorder %s1067_s16, %s1063_s15  ;;  %p156_p6 = scmp.eq.s32.totalorder %s800_s27, 3 }
   0xc   : > { %p1176_p5 = por %p150_p2, %p149_p1  ;;  %s1404_s25 = smov (%p32_p3, %s1402_s25), 0 }
   0xd   : > { %p1182_p7 = por %p156_p6, %p155_p4  ;;  %p807_p8 = scmp.ge.s32.totalorder %s1091_s22, 1 }
   0xe   : > { %s804_s5 = sshll.u32 %s1404_s25, 1  ;;  %p193_p9 = scmp.lt.s32.totalorder %s1091_s22, 5 }
   0xf   : > { %s135_s6 = sadd.s32 %s804_s5, %s1400_s24  ;;  %s139_s7 = sadd.s32 1, %s1071_s17 }
  0x10   : > { %s136_s8 = ssub.s32 %s133_s28, %s135_s6  ;;  %p194_p10 = pnand %p807_p8, %p193_p9 }
  0x11   : > { %p137_p11 = scmp.eq.s32.totalorder %s136_s8, 0  ;;  %s223_s10 = sand.u32 (!%p194_p10), 1, %s1067_s16  }
  0x12   : > { %197 = sbr.rel (%p194_p10) target bundleno = 1099 (0x44b), region = 32  ;;  %s809_s11 = sshll.u32 (!%p194_p10), %s1079_s19, 1 }
  0x13   : > { %s1192_s9 = scalar_select %p137_p11, %s1071_s17, %s139_s7  }
  0x14   : > { %s808_s12 = sshll.u32 (!%p194_p10), %s223_s10, 4  ;;  %s1199_s13 = sadd.s32 (!%p194_p10), %s1075_s18, %s809_s11 }
  0x15   : > { %s810_s14 = sshll.u32 (!%p194_p10), %s1199_s13, 1  ;;  %p236_p13 = scmp.lt.s32.totalorder (!%p194_p10), %s1079_s19, 1 }
  0x16   : > { %p229_p12 = scmp.lt.s32.totalorder (!%p194_p10), %s810_s14, 7  ;;  %s1214_s11 = scalar_lea.vmem (!%p194_p10), [#allocation2], %s808_s12 }
  0x17   : > { %s1408_s19 = smov (!%p236_p13, %s1079_s19), 1  ;;  %p814_p0 = scmp.ne.s32.totalorder %s1075_s18, 0 }
  0x18   : > { %s1406_s14 = smov (!%p229_p12, %s810_s14), 7  ;;  %s841_s5 = sshll.u32 %s1408_s19, 6 }
  0x19   : > { %s811_s23 = sshll.u32 %s1406_s14, 3  ;;  %s1212_s8 = scalar_lea.vmem %s1388_s3, %s841_s5 }
  0x1a   : > { %s1207_s28 = scalar_lea.vmem %s1385_s0, %s811_s23  ;;  %247 = sbr.rel (%p814_p0) target bundleno = 36 (0x24), region = 36 }
  0x1f   : > { %vm248_vm0 = vcmask 261120   ;;  %v1093_v0 = vmov 0.0  }
  0x20   : > { %249 = vst.msk [vmem:[%s1212_s8] sm:$0xff] %vm248_vm0, %v1093_v0  ;;  %250 = vst.msk [vmem:[%s1212_s8 + $0x8] sm:$0xff] %vm248_vm0, %v1093_v0 }
  0x21   : > { %251 = vst.msk [vmem:[%s1212_s8 + $0x10] sm:$0xff] %vm248_vm0, %v1093_v0  ;;  %252 = vst.msk [vmem:[%s1212_s8 + $0x18] sm:$0xff] %vm248_vm0, %v1093_v0 }
  0x22   : > { %253 = vst.msk [vmem:[%s1212_s8 + $0x20] sm:$0xff] %vm248_vm0, %v1093_v0  ;;  %254 = vst.msk [vmem:[%s1212_s8 + $0x28] sm:$0xff] %vm248_vm0, %v1093_v0 }
  0x23   : > { %255 = vst.msk [vmem:[%s1212_s8 + $0x30] sm:$0xff] %vm248_vm0, %v1093_v0  ;;  %256 = vst.msk [vmem:[%s1212_s8 + $0x38] sm:$0xff] %vm248_vm0, %v1093_v0 }
  0x24 PF: > { %v262_v1 = vld [vmem:[%s1387_s2 + $0x18] sm:$0xff]  ;;  %v261_v2 = vld [vmem:[%s1387_s2 + $0x10] sm:$0xff]  ;;  %vm263_vm1 = vcmask 261120   ;;  %v257_v3 = vld [vmem:[%s1207_s28] sm:$0xff]  ;;  %vm458_vm2 = vcmask 523264   ;;  %s1094_s14 = smov 96  }
  0x25   : > { %869 = vmatprep.subr.mxu0 %v262_v1  ;;  %v260_v4 = vld [vmem:[%s1387_s2 + $0x8] sm:$0xff]  ;;  %877 = vmatprep.mubr.msk.f32.mxu0 %vm263_vm1, %v257_v3  ;;  %v352_v5 = vld [vmem:[%s1386_s1 + $0x38] sm:$0xff]  ;;  %v351_v6 = vld [vmem:[%s1386_s1 + $0x30] sm:$0xff]  ;;  %vm521_vm3 = vcmask 130048   ;;  %s842_s23 = sshll.u32 %s1199_s13, 8  ;;  %s699_s26 = sshll.u32 %s1214_s11, 4  ;;  %s1306_s26 = int_to_ptr.vmem [resolvable:$true] %s699_s26 }
  0x26   : > { %870 = vmatpush3.msra.mxu0 %v262_v1  ;;  %880 = vmatprep.subr.msk.mxu1 %vm263_vm1, %v352_v5  ;;  %v259_v7 = vld [vmem:[%s1387_s2] sm:$0xff]  ;;  %v258_v8 = vld [vmem:[%s1207_s28 + $0x8] sm:$0xff]  ;;  %v348_v11 = vld [vmem:[%s1386_s1 + $0x18] sm:$0xff]  ;;  %s1304_s5 = scalar_lea.hbm %s1389_s4, %s842_s23  ;;  %s1310_s6 = scalar_lea.sflag [#allocation3], %s223_s10 }
  0x27   : > { %871 = vmatprep.subr.mxu0 %v261_v2  ;;  %881 = vmatpush3.xpose.msk.msra.mxu1 %vm263_vm1, %v352_v5  ;;  %v350_v9 = vld [vmem:[%s1386_s1 + $0x28] sm:$0xff]  ;;  %v349_v10 = vld [vmem:[%s1386_s1 + $0x20] sm:$0xff]  ;;  %v347_v12 = vld [vmem:[%s1386_s1 + $0x10] sm:$0xff]  ;;  %s999_s7 = scalar_lea.vmem %s1306_s26, 256  ;;  %s1095_s13 = smov [#allocation2]  }
  0x28   : > { %872 = vmatpush3.msra.mxu0 %v261_v2  ;;  %882 = vmatprep.subr.msk.mxu1 %vm263_vm1, %v351_v6  ;;  %v346_v13 = vld [vmem:[%s1386_s1 + $0x8] sm:$0xff]  ;;  %v345_v14 = vld [vmem:[%s1386_s1] sm:$0xff]  ;;  %p1000_p1 = scmp.ne.s32.totalorder %s1306_s26, %s999_s7 }
  0x29   : > { %873 = vmatprep.subr.mxu0 %v260_v4 }
  0x2a   : > { %874 = vmatpush3.msra.mxu0 %v260_v4  ;;  %p1001_p2 = pnand %p1000_p1, %p1176_p5 }
  0x2b   : > { %875 = vmatprep.subr.mxu0 %v259_v7  ;;  %883 = vmatpush3.xpose.msk.msra.mxu1 %vm263_vm1, %v351_v6 }
  0x2c   : > { %876 = vmatpush3.msra.mxu0 %v259_v7  ;;  %884 = vmatprep.subr.msk.mxu1 %vm263_vm1, %v350_v9  ;;  %p1002_p3 = pneg %p1001_p2 }
  0x2d   : > { %878 = vmatmul.mubr.msk.f32.vlgmr.msra.gmra.mxu0 %vm263_vm1, %v258_v8 }
  0x2f   : > { %885 = vmatpush3.xpose.msk.msra.mxu1 %vm263_vm1, %v350_v9 }
  0x30   : > { %886 = vmatprep.subr.msk.mxu1 %vm263_vm1, %v349_v10 }
  0x33   : > { %887 = vmatpush3.xpose.msk.msra.mxu1 %vm263_vm1, %v349_v10 }
  0x34   : > { %888 = vmatprep.subr.msk.mxu1 %vm263_vm1, %v348_v11 }
  0x37   : > { %889 = vmatpush3.xpose.msk.msra.mxu1 %vm263_vm1, %v348_v11 }
  0x38   : > { %890 = vmatprep.subr.msk.mxu1 %vm263_vm1, %v347_v12 }
  0x3b   : > { %891 = vmatpush3.xpose.msk.msra.mxu1 %vm263_vm1, %v347_v12 }
  0x3c   : > { %892 = vmatprep.subr.msk.mxu1 %vm263_vm1, %v346_v13 }
  0x3f   : > { %893 = vmatpush3.xpose.msk.msra.mxu1 %vm263_vm1, %v346_v13 }
  0x40   : > { %894 = vmatprep.subr.msk.mxu1 %vm263_vm1, %v345_v14 }
  0x43   : > { %895 = vmatpush3.xpose.msk.msra.mxu1 %vm263_vm1, %v345_v14 }
  0xed   : > { %v879_v15 = vpop.f32.mrf.mxu0 }
  0xef   : > { %v336_v16 = vpop.f32.mrf.mxu0 }
  0xf0   : > { %896 = vmatprep.mubr.msk.f32.mxu1 %vm263_vm1, %v336_v16 }
  0xf1   : > { %897 = vmatmul.mubr.msk.f32.vlgmr.msra.gmra.mxu1 %vm263_vm1, %v879_v15 }
 0x1b1   : > { %v898_v17 = vpop.f32.mrf.mxu1 }
 0x1b2   : > { %v462_v20 = vsel %vm458_vm2, %v898_v17, -inf }
 0x1b3   : > { %v449_v18 = vpop.f32.mrf.mxu1 }
 0x1b4   : > { %v459_v19 = vsel %vm458_vm2, %v449_v18, -inf }
 0x1b5   : > { %460 = vmax.xlane.f32.xlu0 %v459_v19 }
 0x1b9   : > { %463 = vmax.xlane.f32.xlu0 %v462_v20 }
 0x1cf   : > { %517 = vrot.lane.b32.xlu0 %v879_v15, %s1094_s14 }
 0x23e   : > { %v461_v21 = vpop.xlane.xlu0 %460 }
 0x23f   : > { %v465_v22 = vsub.f32 %v449_v18, %v461_v21 }
 0x241   : > { %v467_v23 = vmul.f32 1.442695, %v465_v22 }
 0x242   : > { %v464_v24 = vpop.xlane.xlu0 %463 }
 0x243   : > { %991 = vpow2.f32 %v467_v23  ;;  %v466_v25 = vsub.f32 %v898_v17, %v464_v24 }
 0x245   : > { %v469_v26 = vmul.f32 1.442695, %v466_v25 }
 0x246   : > { %v518_v27 = vpop.permute.xlu0 %517 }
 0x247   : > { %993 = vpow2.f32 %v469_v26  ;;  %899 = vmatprep.subr.mxu0 %v518_v27 }
 0x248   : > { %900 = vmatpush3.msra.mxu0 %v518_v27 }
 0x250   : > { %v992_v28 = vpop.eup %991 }
 0x251   : > { %v471_v29 = vsel %vm458_vm2, %v992_v28, 0.0 }
 0x252   : > { %472 = vadd.xlane.f32.xlu1 %v471_v29 }
 0x254   : > { %v994_v30 = vpop.eup %993 }
 0x255   : > { %v474_v31 = vsel %vm458_vm2, %v994_v30, 0.0 }
 0x256   : > { %475 = vadd.xlane.f32.xlu1 %v474_v31 }
 0x267   : > { %515 = vrot.lane.b32.xlu1 %v336_v16, %s1094_s14 }
 0x2db   : > { %v473_v32 = vpop.xlane.xlu1 %472 }
 0x2dc   : > { %995 = vrcp.f32 %v473_v32 }
 0x2df   : > { %v476_v33 = vpop.xlane.xlu1 %475 }
 0x2e0   : > { %997 = vrcp.f32 %v476_v33 }
 0x2e3   : > { %v516_v34 = vpop.permute.xlu1 %515 }
 0x2e4   : > { %901 = vmatprep.subr.mxu0 %v516_v34 }
 0x2e5   : > { %902 = vmatpush3.msra.mxu0 %v516_v34 }
 0x2e9   : > { %v996_v35 = vpop.eup %995 }
 0x2ea   : > { %v478_v36 = vmul.f32 %v996_v35, %v992_v28 }
 0x2ec   : > { %481 = vst.msk [vmem:[%s1214_s11] sm:$0xff] %vm458_vm2, %v478_v36  ;;  %483 = vxpose.xlu1.b32.start [1/2] (short) (narrow) %v478_v36, 64 }
 0x2ed   : > { %v998_v37 = vpop.eup %997 }
 0x2ee   : > { %v480_v38 = vmul.f32 %v998_v37, %v994_v30 }
 0x2f0   : > { %484 = vxpose.xlu1.b32.end [2/2] (short) (narrow) %v480_v38, 64  ;;  %482 = vst.msk [vmem:[%s1214_s11 + $0x8] sm:$0xff] %vm458_vm2, %v480_v38  ;;  %s1003_s11 = sshll.u32 %s1095_s13, 4  ;;  %s1004_s11 = int_to_ptr.vmem [resolvable:$false] %s1003_s11 }
 0x2f1   : > { %s1005_s18 = scalar_lea.vmem %s1004_s11, 512  ;;  %p1006_p4 = scmp.lt.s32.totalorder %s1306_s26, %s1004_s11 }
 0x2f2   : > { %p1007_p6 = scmp.lt.s32.totalorder %s1005_s18, %s999_s7 }
 0x2f4   : > { %p1008_p8 = por %p1007_p6, %p1006_p4 }
 0x2f6   : > { %p1009_p9 = pnand %p1008_p8, %p1002_p3 }
 0x368   : > { %v499_v39 = vpop.trf.xlu1 }
 0x369   : > { %903 = vmatprep.mubr.msk.f32.mxu0 %vm521_vm3, %v499_v39 }
 0x36c   : > { %v500_v40 = vpop.trf.xlu1 }
 0x36d   : > { %904 = vmatmul.mubr.msk.f32.vlgmr.msra.gmra.mxu0 %vm521_vm3, %v500_v40 }
 0x370   : > { %v501_v41 = vpop.trf.xlu1 }
 0x371   : > { %906 = vmatprep.mubr.msk.f32.mxu0 %vm521_vm3, %v501_v41 }
 0x374   : > { %v502_v42 = vpop.trf.xlu1 }
 0x375   : > { %907 = vmatmul.mubr.msk.f32.gmra.mxu0 %vm521_vm3, %v502_v42 }
 0x378   : > { %v503_v43 = vpop.trf.xlu1 }
 0x379   : > { %909 = vmatprep.mubr.msk.f32.mxu0 %vm521_vm3, %v503_v43 }
 0x37c   : > { %v504_v44 = vpop.trf.xlu1 }
 0x37d   : > { %910 = vmatmul.mubr.msk.f32.gmra.mxu0 %vm521_vm3, %v504_v44 }
 0x380   : > { %v505_v45 = vpop.trf.xlu1 }
 0x381   : > { %912 = vmatprep.mubr.msk.f32.mxu0 %vm521_vm3, %v505_v45 }
 0x384   : > { %v506_v46 = vpop.trf.xlu1 }
 0x385   : > { %913 = vmatmul.mubr.msk.f32.gmra.mxu0 %vm521_vm3, %v506_v46 }
 0x386   : > { %1012 = shalt.err (!%p1009_p9)
}
 0x387   : > { %s1013_s10 = scalar_lea.hbm %s1304_s5, 256  ;;  %s1017_s14 = scalar_lea.hbm %s1389_s4, 1024 }
 0x388   : > { %p1014_p10 = scmp.ne.s32.totalorder %s1304_s5, %s1013_s10  ;;  %p1018_p13 = scmp.lt.s32.totalorder %s1304_s5, %s1389_s4 }
 0x389   : > { %p1019_p0 = scmp.lt.s32.totalorder %s1017_s14, %s1013_s10 }
 0x38a   : > { %p1015_p11 = pnand %p1014_p10, %p1176_p5 }
 0x38b   : > { %p1020_p1 = por %p1019_p0, %p1018_p13 }
 0x38c   : > { %p1016_p12 = pneg %p1015_p11 }
 0x38e   : > { %p1021_p2 = pnand %p1020_p1, %p1016_p12 }
 0x390   : > { %1024 = shalt.err (!%p1021_p2)
}
 0x391   : > { %s1096_s27 = smov 128   ;;  %s1097_s7 = smov 8   ;;  %v652_v47 = vld [vmem:[%s1212_s8 + $0x8] sm:$0xff]  ;;  %v651_v49 = vld [vmem:[%s1212_s8] sm:$0xff]  ;;  %v654_v53 = vld [vmem:[%s1212_s8 + $0x18] sm:$0xff] }
 0x392   : > { %915 = dma.vmem_to_hbm [thread:$0]  (%p1176_p5), %s1306_s26, 256, %s1304_s5, %s1310_s6, %s1096_s27, %s1096_s27, %s1097_s7  }
 0x393   : > { %v653_v55 = vld [vmem:[%s1212_s8 + $0x10] sm:$0xff]  ;;  %v656_v59 = vld [vmem:[%s1212_s8 + $0x28] sm:$0xff]  ;;  %v655_v61 = vld [vmem:[%s1212_s8 + $0x20] sm:$0xff] }
 0x394   : > { %v658_v1 = vld [vmem:[%s1212_s8 + $0x38] sm:$0xff]  ;;  %v657_v3 = vld [vmem:[%s1212_s8 + $0x30] sm:$0xff] }
 0x42d   : > { %v905_v48 = vpop.f32.mrf.mxu0 }
 0x42e   : > { %v660_v50 = vadd.f32 %v905_v48, %v652_v47 }
 0x42f   : > { %v612_v51 = vpop.f32.mrf.mxu0 }
 0x430   : > { %668 = vst.msk [vmem:[%s1212_s8 + $0x8] sm:$0xff] %vm263_vm1, %v660_v50  ;;  %v659_v52 = vadd.f32 %v651_v49, %v612_v51 }
 0x432   : > { %667 = vst.msk [vmem:[%s1212_s8] sm:$0xff] %vm263_vm1, %v659_v52 }
 0x435   : > { %v908_v54 = vpop.f32.mrf.mxu0 }
 0x436   : > { %v662_v56 = vadd.f32 %v908_v54, %v654_v53 }
 0x437   : > { %v622_v57 = vpop.f32.mrf.mxu0 }
 0x438   : > { %670 = vst.msk [vmem:[%s1212_s8 + $0x18] sm:$0xff] %vm263_vm1, %v662_v56  ;;  %v661_v58 = vadd.f32 %v653_v55, %v622_v57 }
 0x43a   : > { %669 = vst.msk [vmem:[%s1212_s8 + $0x10] sm:$0xff] %vm263_vm1, %v661_v58 }
 0x43d   : > { %v911_v60 = vpop.f32.mrf.mxu0 }
 0x43e   : > { %v664_v62 = vadd.f32 %v911_v60, %v656_v59 }
 0x43f   : > { %v632_v63 = vpop.f32.mrf.mxu0 }
 0x440   : > { %672 = vst.msk [vmem:[%s1212_s8 + $0x28] sm:$0xff] %vm263_vm1, %v664_v62  ;;  %v663_v0 = vadd.f32 %v655_v61, %v632_v63 }
 0x442   : > { %671 = vst.msk [vmem:[%s1212_s8 + $0x20] sm:$0xff] %vm263_vm1, %v663_v0 }
 0x445   : > { %v914_v2 = vpop.f32.mrf.mxu0 }
 0x446   : > { %v666_v4 = vadd.f32 %v914_v2, %v658_v1 }
 0x447   : > { %v642_v5 = vpop.f32.mrf.mxu0 }
 0x448   : > { %674 = vst.msk [vmem:[%s1212_s8 + $0x38] sm:$0xff] %vm263_vm1, %v666_v4  ;;  %v665_v6 = vadd.f32 %v657_v3, %v642_v5 }
 0x44a   : > { %673 = vst.msk [vmem:[%s1212_s8 + $0x30] sm:$0xff] %vm263_vm1, %v665_v6 }
 0x44b PF: > { %p921_p5 = scmp.ge.s32.totalorder %s1091_s22, 2  ;;  %s722_s29 = sand.u32 1, %s1063_s15  }
 0x44c   : > { %s723_s26 = scalar_lea.sflag [#allocation3], %s722_s29 }
 0x44d   : > { %p918_p3 = pnand %p921_p5, %p1182_p7 }
 0x44f   : > { %p919_p4 = pneg %p918_p3 }
 0x451   : > { %1058 = dma.done.wait (%p919_p4), %s723_s26, 256  }
 0x452   : > { %1060 = vsyncadd (%p919_p4), %s723_s26, 4294967040  ;;  %s18_s22 = sadd.s32 1, %s1091_s22   ;;  %s1392_s15 = smov %s1067_s16 }
 0x453   : > { %p15_p6 = scmp.ge.s32.totalorder %s18_s22, 6   ;;  %s1393_s16 = smov %s1071_s17 }
 0x454   : > { %s1394_s17 = smov %s1192_s9  ;;  %s1395_s18 = smov %s1083_s20 }
 0x455   : > { %s1396_s19 = smov %s1087_s21  ;;  %s1397_s20 = smov %s1400_s24 }
 0x456   : > { %s1398_s21 = smov %s1404_s25  ;;  %17 = sbr.rel (!%p15_p6) target bundleno = 5 (0x5), region = 83 }
 0x45b   :  { %728 = vsyncpa [#allocation3], 1 }
 0x45c   :  { %730 = vsyncpa [#allocation3 + $0x1], 1 }

</bundles_post_ra>
